<compile_context>
chip_gen: v7x
topology: tpu7x:2x2x1
jax: 0.10.0
libtpu: 0.0.40
codegen_flags: <defaults>
</compile_context>

<pallas_src>
import jax
import jax.numpy as jnp
from jax import lax
from jax.experimental import pallas as pl
from jax.experimental.pallas import tpu as pltpu
import numpy as np

# ---------------- static config (cfg.local_encoder) ----------------
B, N, T = 2, 4, 16          # input (B, N, T)
C1, K1, P1 = 8, 3, 1        # conv layer 1 (stride 1)
C2, K2, P2 = 16, 3, 1       # conv layer 2 (stride 1)
FEAT = 32                   # feature_dim

L1 = T + 2 * P1 - K1 + 1    # conv1 output length (16)
L2 = L1 + 2 * P2 - K2 + 1   # conv2 output length (16)

ZP = 8                      # sublane-aligned zero pad rows in the conv2 scratch
H1P = ZP + L1 + ZP          # scratch time extent (32)

TM_MAX = 512                # max rows per grid step (multiple of 8, >= MXU M)


def make_kernel(tm):
    def kernel(x_ref, w1_ref, b1_ref, w2_ref, b2_ref, wl_ref, bl_ref,
               out_ref, h1p_ref):
        # ---- Conv1d #1 (in_channels == 1) + bias + ReLU on the VPU ----
        # x_ref: (tm, T + 2*P1) pre-padded signals, time on lanes.
        xT = x_ref[...][:, :, None]                   # (tm, T_pad, 1): single time->sublane relayout
        w1 = w1_ref[...]                              # (C1, K1)
        h1 = xT[:, 0:L1, :] * w1[:, 0][None, None, :]
        for k in range(1, K1):                        # small static unroll
            h1 = h1 + xT[:, k:k + L1, :] * w1[:, k][None, None, :]
        h1 = jnp.maximum(h1 + b1_ref[...][None, :, :], 0.0)   # (tm, L1, C1)

        # ---- zero-edged VMEM scratch (replaces jnp.concatenate padding) ----
        # rows [ZP, ZP+L1) hold h1; rows ZP-1 / ZP+L1 are the P2 zeros actually
        # read by conv2.  All three stores are 8-sublane aligned.
        h1p_ref[:, 0:ZP, :] = jnp.zeros((tm, ZP, C1), jnp.float32)
        h1p_ref[:, ZP + L1:, :] = jnp.zeros((tm, ZP, C1), jnp.float32)
        h1p_ref[:, ZP:ZP + L1, :] = h1
        h1p = h1p_ref[...]                            # (tm, H1P, C1)

        # ---- Conv1d #2 as ONE im2col MXU matmul (K = K2*C1 = 24) ----
        parts = [
            h1p[:, ZP - P2 + k: ZP - P2 + k + L2, :].reshape(tm * L2, C1)
            for k in range(K2)
        ]
        cols2 = jnp.concatenate(parts, axis=-1)       # (tm*L2, K2*C1)
        h2 = jnp.dot(cols2, w2_ref[...], preferred_element_type=jnp.float32)
        h2 = jnp.maximum(h2 + b2_ref[...], 0.0)       # (tm*L2, C2)

        # ---- AdaptiveAvgPool1d(1) + Flatten + Linear + ReLU ----
        # The 1/L2 mean scale is folded into wl_ref at trace time.
        pooled = h2.reshape(tm, L2, C2).sum(axis=1)   # (tm, C2)
        out = jnp.dot(pooled, wl_ref[...],
                      preferred_element_type=jnp.float32) + bl_ref[...]
        out_ref[...] = jnp.maximum(out, 0.0)          # (tm, FEAT)

    return kernel


def local_encoder_pallas(x, params):
    """x: (B, N, T) float32 -> (B, N, FEAT) float32."""
    w1, b1, w2, b2, wl, bl = params
    b, n, t = x.shape
    m = b * n

    # --- trace-time weight repacking (layout plumbing, outside the kernel) ---
    # conv2 weight -> im2col layout: w2f[k*C1 + c, o] = w2[o, c, k]
    w2f = jnp.transpose(w2, (2, 1, 0)).reshape(K2 * C1, C2)
    # linear weight transposed, with the AdaptiveAvgPool 1/L2 folded in
    wlT = jnp.transpose(wl) * (1.0 / L2)

    # --- M tiling: large tiles amortize per-step overhead; remainder padded ---
    tm = min(TM_MAX, pl.cdiv(m, 8) * 8)
    m_pad = pl.cdiv(m, tm) * tm

    x_flat = x.reshape(m, t)
    x_pad = jnp.pad(x_flat, ((0, m_pad - m), (P1, P1)))   # conv1 "same" pad + row pad
    tpad = t + 2 * P1

    out = pl.pallas_call(
        make_kernel(tm),
        out_shape=jax.ShapeDtypeStruct((m_pad, FEAT), jnp.float32),
        grid=(m_pad // tm,),
        in_specs=[
            pl.BlockSpec((tm, tpad), lambda i: (i, 0)),       # signals, tiled over M
            pl.BlockSpec((C1, K1), lambda i: (0, 0)),         # conv1 weight
            pl.BlockSpec((1, C1), lambda i: (0, 0)),          # conv1 bias
            pl.BlockSpec((K2 * C1, C2), lambda i: (0, 0)),    # conv2 weight (im2col layout)
            pl.BlockSpec((1, C2), lambda i: (0, 0)),          # conv2 bias
            pl.BlockSpec((C2, FEAT), lambda i: (0, 0)),       # linear weight (1/L2 folded in)
            pl.BlockSpec((1, FEAT), lambda i: (0, 0)),        # linear bias
        ],
        out_specs=pl.BlockSpec((tm, FEAT), lambda i: (i, 0)),
        scratch_shapes=[pltpu.VMEM((tm, H1P, C1), jnp.float32)],
        # VMEM footprint at tm=512 is ~2-3 MiB f32: comfortably inside the
        # scoped default on v5e/v6e and v7x's 64 MiB, so no vmem override.
        compiler_params=pltpu.CompilerParams(
            dimension_semantics=("parallel",)),
    )(x_pad, w1, b1, w2f, b2, wlT, bl)

    return out[:m].reshape(b, n, FEAT)


def local_encoder_reference(x, params):
    """Pure-JAX reference matching the PyTorch forward pass."""
    w1, b1, w2, b2, wl, bl = params
    b, n, t = x.shape
    h = x.reshape(b * n, 1, t)
    dn = ("NCH", "OIH", "NCH")
    h = lax.conv_general_dilated(h, w1[:, None, :], (1,), ((P1, P1),),
                                 dimension_numbers=dn) + b1.reshape(1, -1, 1)
    h = jnp.maximum(h, 0.0)
    h = lax.conv_general_dilated(h, w2, (1,), ((P2, P2),),
                                 dimension_numbers=dn) + b2.reshape(1, -1, 1)
    h = jnp.maximum(h, 0.0)
    pooled = h.mean(axis=-1)                          # AdaptiveAvgPool1d(1) + Flatten
    out = jnp.maximum(pooled @ wl.T + bl.reshape(1, -1), 0.0)
    return out.reshape(b, n, -1)


def init_params(key):
    ks = jax.random.split(key, 6)

    def uni(k, shape, fan_in):
        bound = 1.0 / np.sqrt(fan_in)
        return jax.random.uniform(k, shape, jnp.float32, -bound, bound)

    w1 = uni(ks[0], (C1, K1), 1 * K1)        # Conv1d(1, C1, K1) weight, C_in squeezed
    b1 = uni(ks[1], (1, C1), 1 * K1)
    w2 = uni(ks[2], (C2, C1, K2), C1 * K2)   # Conv1d(C1, C2, K2) weight
    b2 = uni(ks[3], (1, C2), C1 * K2)
    wl = uni(ks[4], (FEAT, C2), C2)          # Linear(C2, FEAT) weight
    bl = uni(ks[5], (1, FEAT), C2)
    return (w1, b1, w2, b2, wl, bl)


if __name__ == "__main__":
    key = jax.random.PRNGKey(0)
    kx, kp = jax.random.split(key)
    x = jax.random.normal(kx, (B, N, T), jnp.float32)
    params = init_params(kp)

    out = jax.block_until_ready(local_encoder_pallas(x, params))
    ref = jax.block_until_ready(local_encoder_reference(x, params))

    assert out.shape == (B, N, FEAT), out.shape
    np.testing.assert_allclose(np.asarray(out), np.asarray(ref),
                               rtol=1e-5, atol=1e-5)
    print("KERNEL_OK")
</pallas_src>

<mosaic_0001>
module attributes {stable_mosaic.version = 11 : i64} {
  func.func @kernel(%arg0: i32, %arg1: memref<8x18xf32, #tpu.memory_space<vmem>>, %arg2: memref<8x3xf32, #tpu.memory_space<vmem>>, %arg3: memref<1x8xf32, #tpu.memory_space<vmem>>, %arg4: memref<24x16xf32, #tpu.memory_space<vmem>>, %arg5: memref<1x16xf32, #tpu.memory_space<vmem>>, %arg6: memref<16x32xf32, #tpu.memory_space<vmem>>, %arg7: memref<1x32xf32, #tpu.memory_space<vmem>>, %arg8: memref<8x32xf32, #tpu.memory_space<vmem>>, %arg9: memref<8x32x8xf32, #tpu.memory_space<vmem>>) attributes {dimension_semantics = [#tpu.dimension_semantics<parallel>], iteration_bounds = array<i64: 1>, scalar_prefetch = 0 : i64, scratch_operands = 1 : i64, tpu.core_type = #tpu.core_type<tc>, window_params = [{transform_indices = @transform_0, window_bounds = array<i64: 8, 18>}, {pipeline_mode = #tpu.pipeline_mode<synchronous>, transform_indices = @transform_1, window_bounds = array<i64: 8, 3>}, {pipeline_mode = #tpu.pipeline_mode<synchronous>, transform_indices = @transform_2, window_bounds = array<i64: 1, 8>}, {pipeline_mode = #tpu.pipeline_mode<synchronous>, transform_indices = @transform_3, window_bounds = array<i64: 24, 16>}, {pipeline_mode = #tpu.pipeline_mode<synchronous>, transform_indices = @transform_4, window_bounds = array<i64: 1, 16>}, {pipeline_mode = #tpu.pipeline_mode<synchronous>, transform_indices = @transform_5, window_bounds = array<i64: 16, 32>}, {pipeline_mode = #tpu.pipeline_mode<synchronous>, transform_indices = @transform_6, window_bounds = array<i64: 1, 32>}, {transform_indices = @transform_7, window_bounds = array<i64: 8, 32>}]} {
    %c0 = arith.constant 0 : index
    %c0_0 = arith.constant 0 : index
    %0 = vector.load %arg1[%c0, %c0_0] : memref<8x18xf32, #tpu.memory_space<vmem>>, vector<8x18xf32>
    %1 = vector.shape_cast %0 : vector<8x18xf32> to vector<8x18x1xf32>
    %c0_1 = arith.constant 0 : index
    %c0_2 = arith.constant 0 : index
    %2 = vector.load %arg2[%c0_1, %c0_2] : memref<8x3xf32, #tpu.memory_space<vmem>>, vector<8x3xf32>
    %3 = vector.extract_strided_slice %1 {offsets = [0, 0, 0], sizes = [8, 16, 1], strides = [1, 1, 1]} : vector<8x18x1xf32> to vector<8x16x1xf32>
    %4 = vector.extract_strided_slice %2 {offsets = [0, 0], sizes = [8, 1], strides = [1, 1]} : vector<8x3xf32> to vector<8x1xf32>
    %5 = vector.shape_cast %4 : vector<8x1xf32> to vector<8xf32>
    %6 = vector.shape_cast %5 : vector<8xf32> to vector<1x1x8xf32>
    %7 = vector.broadcast %3 : vector<8x16x1xf32> to vector<8x16x8xf32>
    %8 = vector.broadcast %6 : vector<1x1x8xf32> to vector<8x16x8xf32>
    %9 = arith.mulf %7, %8 : vector<8x16x8xf32>
    %10 = vector.extract_strided_slice %1 {offsets = [0, 1, 0], sizes = [8, 16, 1], strides = [1, 1, 1]} : vector<8x18x1xf32> to vector<8x16x1xf32>
    %11 = vector.extract_strided_slice %2 {offsets = [0, 1], sizes = [8, 1], strides = [1, 1]} : vector<8x3xf32> to vector<8x1xf32>
    %12 = vector.shape_cast %11 : vector<8x1xf32> to vector<8xf32>
    %13 = vector.shape_cast %12 : vector<8xf32> to vector<1x1x8xf32>
    %14 = vector.broadcast %10 : vector<8x16x1xf32> to vector<8x16x8xf32>
    %15 = vector.broadcast %13 : vector<1x1x8xf32> to vector<8x16x8xf32>
    %16 = arith.mulf %14, %15 : vector<8x16x8xf32>
    %17 = arith.addf %9, %16 : vector<8x16x8xf32>
    %18 = vector.extract_strided_slice %1 {offsets = [0, 2, 0], sizes = [8, 16, 1], strides = [1, 1, 1]} : vector<8x18x1xf32> to vector<8x16x1xf32>
    %19 = vector.extract_strided_slice %2 {offsets = [0, 2], sizes = [8, 1], strides = [1, 1]} : vector<8x3xf32> to vector<8x1xf32>
    %20 = vector.shape_cast %19 : vector<8x1xf32> to vector<8xf32>
    %21 = vector.shape_cast %20 : vector<8xf32> to vector<1x1x8xf32>
    %22 = vector.broadcast %18 : vector<8x16x1xf32> to vector<8x16x8xf32>
    %23 = vector.broadcast %21 : vector<1x1x8xf32> to vector<8x16x8xf32>
    %24 = arith.mulf %22, %23 : vector<8x16x8xf32>
    %25 = arith.addf %17, %24 : vector<8x16x8xf32>
    %c0_3 = arith.constant 0 : index
    %c0_4 = arith.constant 0 : index
    %26 = vector.load %arg3[%c0_3, %c0_4] : memref<1x8xf32, #tpu.memory_space<vmem>>, vector<1x8xf32>
    %27 = vector.shape_cast %26 : vector<1x8xf32> to vector<1x1x8xf32>
    %28 = vector.broadcast %27 : vector<1x1x8xf32> to vector<8x16x8xf32>
    %29 = arith.addf %25, %28 : vector<8x16x8xf32>
    %cst = arith.constant 0.000000e+00 : f32
    %30 = vector.broadcast %cst : f32 to vector<8x16x8xf32>
    %31 = arith.maximumf %29, %30 : vector<8x16x8xf32>
    %cst_5 = arith.constant 0.000000e+00 : f32
    %32 = vector.broadcast %cst_5 : f32 to vector<8x8x8xf32>
    %c0_6 = arith.constant 0 : index
    %c0_7 = arith.constant 0 : index
    %c0_8 = arith.constant 0 : index
    %33 = vector.load %arg9[%c0_6, %c0_7, %c0_8] : memref<8x32x8xf32, #tpu.memory_space<vmem>>, vector<8x8x8xf32>
    tpu.vector_store %arg9[%c0_6, %c0_7, %c0_8], %32 {strides = array<i32>} : memref<8x32x8xf32, #tpu.memory_space<vmem>>, vector<8x8x8xf32>,
    %cst_9 = arith.constant 0.000000e+00 : f32
    %34 = vector.broadcast %cst_9 : f32 to vector<8x8x8xf32>
    %c0_10 = arith.constant 0 : index
    %c24 = arith.constant 24 : index
    %c0_11 = arith.constant 0 : index
    %35 = vector.load %arg9[%c0_10, %c24, %c0_11] : memref<8x32x8xf32, #tpu.memory_space<vmem>>, vector<8x8x8xf32>
    tpu.vector_store %arg9[%c0_10, %c24, %c0_11], %34 {strides = array<i32>} : memref<8x32x8xf32, #tpu.memory_space<vmem>>, vector<8x8x8xf32>,
    %c0_12 = arith.constant 0 : index
    %c8 = arith.constant 8 : index
    %c0_13 = arith.constant 0 : index
    %36 = vector.load %arg9[%c0_12, %c8, %c0_13] : memref<8x32x8xf32, #tpu.memory_space<vmem>>, vector<8x16x8xf32>
    tpu.vector_store %arg9[%c0_12, %c8, %c0_13], %31 {strides = array<i32>} : memref<8x32x8xf32, #tpu.memory_space<vmem>>, vector<8x16x8xf32>,
    %c0_14 = arith.constant 0 : index
    %c0_15 = arith.constant 0 : index
    %c0_16 = arith.constant 0 : index
    %37 = vector.load %arg9[%c0_14, %c0_15, %c0_16] : memref<8x32x8xf32, #tpu.memory_space<vmem>>, vector<8x32x8xf32>
    %38 = vector.extract_strided_slice %37 {offsets = [0, 7, 0], sizes = [8, 16, 8], strides = [1, 1, 1]} : vector<8x32x8xf32> to vector<8x16x8xf32>
    %39 = vector.shape_cast %38 : vector<8x16x8xf32> to vector<128x8xf32>
    %40 = vector.extract_strided_slice %37 {offsets = [0, 8, 0], sizes = [8, 16, 8], strides = [1, 1, 1]} : vector<8x32x8xf32> to vector<8x16x8xf32>
    %41 = vector.shape_cast %40 : vector<8x16x8xf32> to vector<128x8xf32>
    %42 = vector.extract_strided_slice %37 {offsets = [0, 9, 0], sizes = [8, 16, 8], strides = [1, 1, 1]} : vector<8x32x8xf32> to vector<8x16x8xf32>
    %43 = vector.shape_cast %42 : vector<8x16x8xf32> to vector<128x8xf32>
    %44 = tpu.concatenate %39, %41, %43 in 1 : vector<128x8xf32>, vector<128x8xf32>, vector<128x8xf32> -> vector<128x24xf32>
    %c0_17 = arith.constant 0 : index
    %c0_18 = arith.constant 0 : index
    %45 = vector.load %arg4[%c0_17, %c0_18] : memref<24x16xf32, #tpu.memory_space<vmem>>, vector<24x16xf32>
    %cst_19 = arith.constant dense<0.000000e+00> : vector<128x16xf32>
    %46 = tpu.matmul %44, %45, %cst_19 {dimension_numbers = #tpu.dot_dimension_numbers<[1], [0], [0], [1], [0, 0, 1, 1], [], []>} : vector<128x24xf32>, vector<24x16xf32>, vector<128x16xf32> -> vector<128x16xf32>
    %c0_20 = arith.constant 0 : index
    %c0_21 = arith.constant 0 : index
    %47 = vector.load %arg5[%c0_20, %c0_21] : memref<1x16xf32, #tpu.memory_space<vmem>>, vector<1x16xf32>
    %48 = vector.broadcast %47 : vector<1x16xf32> to vector<128x16xf32>
    %49 = arith.addf %46, %48 : vector<128x16xf32>
    %cst_22 = arith.constant 0.000000e+00 : f32
    %50 = vector.broadcast %cst_22 : f32 to vector<128x16xf32>
    %51 = arith.maximumf %49, %50 : vector<128x16xf32>
    %52 = vector.shape_cast %51 : vector<128x16xf32> to vector<8x16x16xf32>
    %cst_23 = arith.constant dense<0.000000e+00> : vector<8x16xf32>
    %53 = vector.multi_reduction <add>, %52, %cst_23 [1] : vector<8x16x16xf32> to vector<8x16xf32>
    %c0_24 = arith.constant 0 : index
    %c0_25 = arith.constant 0 : index
    %54 = vector.load %arg6[%c0_24, %c0_25] : memref<16x32xf32, #tpu.memory_space<vmem>>, vector<16x32xf32>
    %cst_26 = arith.constant dense<0.000000e+00> : vector<8x32xf32>
    %55 = tpu.matmul %53, %54, %cst_26 {dimension_numbers = #tpu.dot_dimension_numbers<[1], [0], [0], [1], [0, 0, 1, 1], [], []>} : vector<8x16xf32>, vector<16x32xf32>, vector<8x32xf32> -> vector<8x32xf32>
    %c0_27 = arith.constant 0 : index
    %c0_28 = arith.constant 0 : index
    %56 = vector.load %arg7[%c0_27, %c0_28] : memref<1x32xf32, #tpu.memory_space<vmem>>, vector<1x32xf32>
    %57 = vector.broadcast %56 : vector<1x32xf32> to vector<8x32xf32>
    %58 = arith.addf %55, %57 : vector<8x32xf32>
    %cst_29 = arith.constant 0.000000e+00 : f32
    %59 = vector.broadcast %cst_29 : f32 to vector<8x32xf32>
    %60 = arith.maximumf %58, %59 : vector<8x32xf32>
    %c0_30 = arith.constant 0 : index
    %c0_31 = arith.constant 0 : index
    %61 = vector.load %arg8[%c0_30, %c0_31] : memref<8x32xf32, #tpu.memory_space<vmem>>, vector<8x32xf32>
    tpu.vector_store %arg8[%c0_30, %c0_31], %60 {strides = array<i32>} : memref<8x32xf32, #tpu.memory_space<vmem>>, vector<8x32xf32>,
    return
  }
  func.func @transform_0(%arg0: i32) -> (i32, i32) {
    %c0_i32 = arith.constant 0 : i32
    %c0_i32_0 = arith.constant 0 : i32
    return %arg0, %c0_i32 : i32, i32
  }
  func.func @transform_1(%arg0: i32) -> (i32, i32) {
    %c0_i32 = arith.constant 0 : i32
    %c0_i32_0 = arith.constant 0 : i32
    %c0_i32_1 = arith.constant 0 : i32
    return %c0_i32, %c0_i32_0 : i32, i32
  }
  func.func @transform_2(%arg0: i32) -> (i32, i32) {
    %c0_i32 = arith.constant 0 : i32
    %c0_i32_0 = arith.constant 0 : i32
    %c0_i32_1 = arith.constant 0 : i32
    return %c0_i32, %c0_i32_0 : i32, i32
  }
  func.func @transform_3(%arg0: i32) -> (i32, i32) {
    %c0_i32 = arith.constant 0 : i32
    %c0_i32_0 = arith.constant 0 : i32
    %c0_i32_1 = arith.constant 0 : i32
    return %c0_i32, %c0_i32_0 : i32, i32
  }
  func.func @transform_4(%arg0: i32) -> (i32, i32) {
    %c0_i32 = arith.constant 0 : i32
    %c0_i32_0 = arith.constant 0 : i32
    %c0_i32_1 = arith.constant 0 : i32
    return %c0_i32, %c0_i32_0 : i32, i32
  }
  func.func @transform_5(%arg0: i32) -> (i32, i32) {
    %c0_i32 = arith.constant 0 : i32
    %c0_i32_0 = arith.constant 0 : i32
    %c0_i32_1 = arith.constant 0 : i32
    return %c0_i32, %c0_i32_0 : i32, i32
  }
  func.func @transform_6(%arg0: i32) -> (i32, i32) {
    %c0_i32 = arith.constant 0 : i32
    %c0_i32_0 = arith.constant 0 : i32
    %c0_i32_1 = arith.constant 0 : i32
    return %c0_i32, %c0_i32_0 : i32, i32
  }
  func.func @transform_7(%arg0: i32) -> (i32, i32) {
    %c0_i32 = arith.constant 0 : i32
    %c0_i32_0 = arith.constant 0 : i32
    return %arg0, %c0_i32 : i32, i32
  }
}

</mosaic_0001>

<bundles_post_ra>
// kernel: tpu_custom_call.1
= control target key start
LH: loop header
LB: loop body
LE: loop exit
PB: predicated region body
PF: predicated region fallthrough
CT: control target
= control target key end

     0   :  { %v28_v1 = vlaneseq  ;;  %v1365_v2 = vmov 1   ;;  %v1366_v3 = vmov 0   ;;  %s1934_s0 = inlined_call_operand.vmem [shape: f32[8,18], index: 0, kind: input, shape index: {}]   ;;  %s1935_s1 = inlined_call_operand.vmem [shape: f32[8,3], index: 1, kind: input, shape index: {}]   ;;  %s1936_s2 = inlined_call_operand.vmem [shape: f32[1,8], index: 2, kind: input, shape index: {}]   ;;  %s1937_s3 = inlined_call_operand.vmem [shape: f32[24,16], index: 3, kind: input, shape index: {}]   ;;  %s1938_s4 = inlined_call_operand.vmem [shape: f32[1,16], index: 4, kind: input, shape index: {}]   ;;  %s1939_s5 = inlined_call_operand.vmem [shape: f32[16,32], index: 5, kind: input, shape index: {}]   ;;  %s1940_s6 = inlined_call_operand.vmem [shape: f32[1,32], index: 6, kind: input, shape index: {}]   ;;  %s1941_s7 = inlined_call_operand.hbm [shape: f32[8,32], index: 7, kind: output, shape index: {}]  }
   0x1   :  { %v148_v0 = vld [vmem:[%s1935_s1] sm:$0xff]  ;;  %1338 = vset.pattern.permute.xlu0 %v1365_v2  ;;  %1340 = vset.pattern.permute.xlu1 %v1366_v3 }
   0x2   :  { %12 = vsyncpa [#allocation4], 0  ;;  %151 = vperm.xlu1 %1340, %v148_v0   ;;  %190 = vperm.xlu0 %1338, %v148_v0   ;;  %v29_v4 = vshrl.u32 %v28_v1, 7  ;;  %v27_v5 = vld [vmem:[%s1934_s0] sm:$0xff]  ;;  %v154_v7 = vand.u32 127, %v28_v1  ;;  %v1367_v8 = vmov 2  }
   0x3   :  { %vm511_vm0 = vcmask 64512   ;;  %v1368_v25 = vmov 0.0   ;;  %vm258_vm1 = vcmask 1046528   ;;  %vm399_vm2 = vcmask 1045504   ;;  %v1478_v56 = vld [vmem:[%s1936_s2] ss:$0 sm:$0xff] }
   0x4   :  { %v30_v6 = vsub.s32 0, %v29_v4  ;;  %v45_v10 = vsub.s32 1, %v29_v4  ;;  %v1420_v11 = vsub.s32 %v154_v7, %v29_v4  ;;  %v60_v13 = vsub.s32 2, %v29_v4  ;;  %520 = vst.msk [vmem:[#allocation2 + $0x18] sm:$0xff] %vm511_vm0, %v1368_v25  ;;  %512 = vst.msk [vmem:[#allocation2] sm:$0xff] %vm511_vm0, %v1368_v25  ;;  %s1369_s2 = smov 8  }
   0x5   :  { %v105_v15 = vsub.s32 5, %v29_v4  ;;  %v75_v17 = vsub.s32 3, %v29_v4  ;;  %v120_v19 = vsub.s32 6, %v29_v4  ;;  %v90_v21 = vsub.s32 4, %v29_v4  ;;  %513 = vst.msk [vmem:[#allocation2 + $0x20] sm:$0xff] %vm511_vm0, %v1368_v25  ;;  %514 = vst.msk [vmem:[#allocation2 + $0x40] sm:$0xff] %vm511_vm0, %v1368_v25 }
   0x6   :  { %1339 = vset.pattern.permute.xlu0 %v1367_v8  ;;  %v31_v9 = vrot.slane %v27_v5, %v30_v6  ;;  %v46_v12 = vrot.slane %v27_v5, %v45_v10  ;;  %v61_v14 = vrot.slane %v27_v5, %v60_v13  ;;  %v135_v23 = vsub.s32 7, %v29_v4  ;;  %515 = vst.msk [vmem:[#allocation2 + $0x60] sm:$0xff] %vm511_vm0, %v1368_v25  ;;  %s1373_s17 = smov [#allocation3]  }
   0x7   :  { %332 = vperm.xlu0 %1339, %v148_v0   ;;  %v106_v16 = vrot.slane %v27_v5, %v105_v15  ;;  %v76_v18 = vrot.slane %v27_v5, %v75_v17  ;;  %v121_v20 = vrot.slane %v27_v5, %v120_v19  ;;  %v91_v22 = vrot.slane %v27_v5, %v90_v21  ;;  %s1231_s18 = sshll.u32 %s1373_s17, 4  ;;  %s1232_s18 = int_to_ptr.vmem [resolvable:$true] %s1231_s18 }
   0x8   :  { %33 = vbcast.lane.b32.xlu1 %v31_v9, 256  ;;  %v136_v24 = vrot.slane %v27_v5, %v135_v23  ;;  %516 = vst.msk [vmem:[#allocation2 + $0x80] sm:$0xff] %vm511_vm0, %v1368_v25  ;;  %517 = vst.msk [vmem:[#allocation2 + $0xa0] sm:$0xff] %vm511_vm0, %v1368_v25  ;;  %vm600_vm3 = vcmask 1040384   ;;  %vm817_vm4 = vcmask 130048   ;;  %vm844_vm5 = vcmask 195584   ;;  %p1346_p1 = scmp.lt.s32.totalorder %s1232_s18, %s1232_s18 }
   0x9   :  { %518 = vst.msk [vmem:[#allocation2 + $0xc0] sm:$0xff] %vm511_vm0, %v1368_v25  ;;  %519 = vst.msk [vmem:[#allocation2 + $0xe0] sm:$0xff] %vm511_vm0, %v1368_v25  ;;  %vm1372_vm6 = vmmov 0   ;;  %vm159_vm7 = vcmask 1041409   ;;  %vm160_vm8 = vcmask 1042434   ;;  %vm162_vm9 = vcmask 1043459  }
   0xa   :  { %521 = vst.msk [vmem:[#allocation2 + $0x38] sm:$0xff] %vm511_vm0, %v1368_v25  ;;  %522 = vst.msk [vmem:[#allocation2 + $0x58] sm:$0xff] %vm511_vm0, %v1368_v25  ;;  %vm164_vm10 = vcmask 1044484   ;;  %vm166_vm11 = vcmask 1045509   ;;  %vm168_vm12 = vcmask 1046534   ;;  %vm170_vm13 = vcmask 1047559  }
   0xb   :  { %41 = vbcast.lane.b32.xlu0 %v31_v9, 272  ;;  %523 = vst.msk [vmem:[#allocation2 + $0x78] sm:$0xff] %vm511_vm0, %v1368_v25  ;;  %524 = vst.msk [vmem:[#allocation2 + $0x98] sm:$0xff] %vm511_vm0, %v1368_v25  ;;  %vm1223_vm14 = vcmask 261120   ;;  %s1341_s19 = scalar_lea.vmem %s1232_s18, 128 }
   0xc   :  { %37 = vbcast.lane.b32.xlu1 %v31_v9, 264  ;;  %525 = vst.msk [vmem:[#allocation2 + $0xb8] sm:$0xff] %vm511_vm0, %v1368_v25  ;;  %526 = vst.msk [vmem:[#allocation2 + $0xd8] sm:$0xff] %vm511_vm0, %v1368_v25  ;;  %p1342_p0 = scmp.ne.s32.totalorder %s1232_s18, %s1341_s19  ;;  %p1347_p2 = scmp.lt.s32.totalorder %s1341_s19, %s1341_s19 }
   0xd   :  { %527 = vst.msk [vmem:[#allocation2 + $0xf8] sm:$0xff] %vm511_vm0, %v1368_v25 }
   0xe   :  { %p1348_p3 = por %p1347_p2, %p1346_p1 }
   0xf   :  { %52 = vbcast.lane.b32.xlu0 %v46_v12, 264 }
  0x10   :  { %48 = vbcast.lane.b32.xlu1 %v46_v12, 256  ;;  %p1349_p4 = pnand %p1348_p3, %p1342_p0 }
  0x13   :  { %63 = vbcast.lane.b32.xlu0 %v61_v14, 256 }
  0x14   :  { %56 = vbcast.lane.b32.xlu1 %v46_v12, 272 }
  0x17   :  { %71 = vbcast.lane.b32.xlu0 %v61_v14, 272 }
  0x18   :  { %67 = vbcast.lane.b32.xlu1 %v61_v14, 264 }
  0x1b   :  { %112 = vbcast.lane.b32.xlu0 %v106_v16, 264 }
  0x1c   :  { %108 = vbcast.lane.b32.xlu1 %v106_v16, 256 }
  0x1f   :  { %78 = vbcast.lane.b32.xlu0 %v76_v18, 256 }
  0x20   :  { %116 = vbcast.lane.b32.xlu1 %v106_v16, 272 }
  0x23   :  { %86 = vbcast.lane.b32.xlu0 %v76_v18, 272 }
  0x24   :  { %82 = vbcast.lane.b32.xlu1 %v76_v18, 264 }
  0x27   :  { %127 = vbcast.lane.b32.xlu0 %v121_v20, 264 }
  0x28   :  { %123 = vbcast.lane.b32.xlu1 %v121_v20, 256 }
  0x2b   :  { %93 = vbcast.lane.b32.xlu0 %v91_v22, 256 }
  0x2c   :  { %131 = vbcast.lane.b32.xlu1 %v121_v20, 272 }
  0x2f   :  { %101 = vbcast.lane.b32.xlu0 %v91_v22, 272 }
  0x30   :  { %97 = vbcast.lane.b32.xlu1 %v91_v22, 264 }
  0x33   :  { %142 = vbcast.lane.b32.xlu0 %v136_v24, 264 }
  0x34   :  { %138 = vbcast.lane.b32.xlu1 %v136_v24, 256 }
  0x38   :  { %146 = vbcast.lane.b32.xlu1 %v136_v24, 272 }
  0x81   :  { %v152_v26 = vpop.permute.xlu1 %151  ;;  %v191_v27 = vpop.permute.xlu0 %190 }
  0x82   :  { %v1455_v28 = vrot.slane %v191_v27, %v1420_v11  ;;  %v1465_v38 = vrot.slane %v152_v26, %v1420_v11 }
  0x85   :  { %v34_v29 = vpop.permute.xlu1 %33 }
  0x86   :  { %v333_v30 = vpop.permute.xlu0 %332  ;;  %v210_v32 = vmul.f32 %v1455_v28, %v34_v29  ;;  %v173_v45 = vmul.f32 %v1465_v38, %v34_v29 }
  0x87   :  { %v1458_v31 = vrot.slane %v333_v30, %v1420_v11 }
  0x88   :  { %v259_v41 = vrot.slane %v210_v32, 1 }
  0x89   :  { %v351_v33 = vmul.f32 %v1458_v31, %v34_v29  ;;  %v38_v34 = vpop.permute.xlu1 %37 }
  0x8a   :  { %v211_v35 = vmul.f32 %v1455_v28, %v38_v34  ;;  %v352_v36 = vmul.f32 %v1458_v31, %v38_v34  ;;  %v42_v37 = vpop.permute.xlu0 %41  ;;  %v174_v49 = vmul.f32 %v1465_v38, %v38_v34 }
  0x8b   :  { %v212_v39 = vmul.f32 %v1455_v28, %v42_v37  ;;  %v353_v40 = vmul.f32 %v1458_v31, %v42_v37  ;;  %v400_v42 = vrot.slane %v351_v33, 2 }
  0x8c   :  { %v260_v43 = vrot.slane %v211_v35, 1  ;;  %v401_v44 = vrot.slane %v352_v36, 2 }
  0x8d   :  { %v262_v46 = vrot.slane %v212_v39, 1  ;;  %v403_v47 = vrot.slane %v353_v40, 2  ;;  %v49_v48 = vpop.permute.xlu1 %48 }
  0x8e   :  { %v261_v50 = vsel %vm258_vm1, %v259_v41, %v260_v43  ;;  %v213_v51 = vmul.f32 %v1455_v28, %v49_v48  ;;  %v53_v52 = vpop.permute.xlu0 %52  ;;  %v354_v55 = vmul.f32 %v1458_v31, %v49_v48  ;;  %v402_v57 = vsel %vm399_vm2, %v400_v42, %v401_v44 }
  0x8f   :  { %v315_v53 = vadd.f32 %v261_v50, %v173_v45  ;;  %v263_v54 = vsel %vm258_vm1, %v260_v43, %v262_v46  ;;  %v214_v60 = vmul.f32 %v1455_v28, %v53_v52  ;;  %v404_v62 = vsel %vm399_vm2, %v401_v44, %v403_v47 }
  0x90   :  { %v316_v58 = vadd.f32 %v263_v54, %v174_v49  ;;  %v264_v59 = vrot.slane %v213_v51, 1  ;;  %v405_v63 = vrot.slane %v354_v55, 2  ;;  %v355_v0 = vmul.f32 %v1458_v31, %v53_v52 }
  0x91   :  { %v456_v61 = vadd.f32 %v402_v57, %v315_v53  ;;  %v57_v1 = vpop.permute.xlu1 %56  ;;  %v265_v3 = vrot.slane %v214_v60, 1  ;;  %v175_v8 = vmul.f32 %v1465_v38, %v49_v48  ;;  %v176_v16 = vmul.f32 %v1465_v38, %v53_v52 }
  0x92   :  { %v457_v2 = vadd.f32 %v404_v62, %v316_v58  ;;  %v215_v4 = vmul.f32 %v1455_v28, %v57_v1  ;;  %v356_v5 = vmul.f32 %v1458_v31, %v57_v1  ;;  %v64_v6 = vpop.permute.xlu0 %63  ;;  %v406_v9 = vrot.slane %v355_v0, 2 }
  0x93   :  { %v479_v7 = vadd.f32 %v1478_v56, %v456_v61  ;;  %v216_v10 = vmul.f32 %v1455_v28, %v64_v6  ;;  %v266_v12 = vsel %vm258_vm1, %v264_v59, %v265_v3  ;;  %v177_v18 = vmul.f32 %v1465_v38, %v64_v6 }
  0x94   :  { %v480_v11 = vadd.f32 %v1478_v56, %v457_v2  ;;  %v267_v13 = vrot.slane %v215_v4, 1  ;;  %v408_v14 = vrot.slane %v356_v5, 2  ;;  %v317_v17 = vadd.f32 %v266_v12, %v175_v8 }
  0x95   :  { %v495_v15 = vmax.f32 %v479_v7, 0.0  ;;  %v68_v19 = vpop.permute.xlu1 %67  ;;  %v407_v21 = vsel %vm399_vm2, %v405_v63, %v406_v9  ;;  %v357_v23 = vmul.f32 %v1458_v31, %v64_v6  ;;  %v269_v29 = vrot.slane %v216_v10, 1 }
  0x96   :  { %v496_v20 = vmax.f32 %v480_v11, 0.0  ;;  %v268_v22 = vsel %vm258_vm1, %v265_v3, %v267_v13  ;;  %v72_v24 = vpop.permute.xlu0 %71  ;;  %v458_v26 = vadd.f32 %v407_v21, %v317_v17  ;;  %v217_v30 = vmul.f32 %v1455_v28, %v68_v19 }
  0x97   :  { %528 = vst.msk [vmem:[#allocation2 + $0x8] sm:$0xff] %vm511_vm0, %v495_v15  ;;  %v318_v27 = vadd.f32 %v268_v22, %v176_v16  ;;  %v409_v32 = vsel %vm399_vm2, %v406_v9, %v408_v14  ;;  %v358_v33 = vmul.f32 %v1458_v31, %v68_v19  ;;  %v218_v34 = vmul.f32 %v1455_v28, %v72_v24 }
  0x98   :  { %529 = vst.msk [vmem:[#allocation2 + $0x10] sm:$0xff] %vm511_vm0, %v496_v20  ;;  %v359_v35 = vmul.f32 %v1458_v31, %v72_v24  ;;  %v481_v36 = vadd.f32 %v1478_v56, %v458_v26  ;;  %v178_v39 = vmul.f32 %v1465_v38, %v68_v19  ;;  %v270_v40 = vrot.slane %v217_v30, 1 }
  0x99   :  { %v459_v37 = vadd.f32 %v409_v32, %v318_v27  ;;  %v109_v41 = vpop.permute.xlu1 %108  ;;  %v410_v42 = vrot.slane %v357_v23, 2  ;;  %v411_v43 = vrot.slane %v358_v33, 2  ;;  %v272_v44 = vrot.slane %v218_v34, 1 }
  0x9a   :  { %v413_v45 = vrot.slane %v359_v35, 2  ;;  %v113_v46 = vpop.permute.xlu0 %112  ;;  %v497_v47 = vmax.f32 %v481_v36, 0.0  ;;  %v271_v49 = vsel %vm258_vm1, %v269_v29, %v270_v40  ;;  %v225_v50 = vmul.f32 %v1455_v28, %v109_v41 }
  0x9b   :  { %v482_v48 = vadd.f32 %v1478_v56, %v459_v37  ;;  %v319_v51 = vadd.f32 %v271_v49, %v177_v18  ;;  %v412_v52 = vsel %vm399_vm2, %v410_v42, %v411_v43  ;;  %v273_v53 = vsel %vm258_vm1, %v270_v40, %v272_v44 }
  0x9c   :  { %530 = vst.msk [vmem:[#allocation2 + $0x28] sm:$0xff] %vm511_vm0, %v497_v47  ;;  %v320_v55 = vadd.f32 %v273_v53, %v178_v39  ;;  %v414_v57 = vsel %vm399_vm2, %v411_v43, %v413_v45  ;;  %v366_v58 = vmul.f32 %v1458_v31, %v109_v41  ;;  %v284_v61 = vrot.slane %v225_v50, 1 }
  0x9d   :  { %v498_v54 = vmax.f32 %v482_v48, 0.0  ;;  %v117_v59 = vpop.permute.xlu1 %116  ;;  %v460_v60 = vadd.f32 %v412_v52, %v319_v51  ;;  %v226_v62 = vmul.f32 %v1455_v28, %v113_v46  ;;  %v367_v63 = vmul.f32 %v1458_v31, %v113_v46 }
  0x9e   :  { %v79_v0 = vpop.permute.xlu0 %78  ;;  %v1515_v1 = vld [vmem:[#allocation2 + $0x8] sm:$0xff]  ;;  %v461_v2 = vadd.f32 %v414_v57, %v320_v55  ;;  %v227_v3 = vmul.f32 %v1455_v28, %v117_v59  ;;  %v368_v4 = vmul.f32 %v1458_v31, %v117_v59  ;;  %v425_v7 = vrot.slane %v366_v58, 2 }
  0x9f   :  { %531 = vst.msk [vmem:[#allocation2 + $0x30] sm:$0xff] %vm511_vm0, %v498_v54  ;;  %705 = vrot.lane.b32.xlu0 %v1515_v1, %s1369_s2  ;;  %v1522_v5 = vld [vmem:[#allocation2 + $0x10] sm:$0xff]  ;;  %v483_v6 = vadd.f32 %v1478_v56, %v460_v60  ;;  %v285_v8 = vrot.slane %v226_v62, 1  ;;  %v426_v9 = vrot.slane %v367_v63, 2  ;;  %v183_v11 = vmul.f32 %v1465_v38, %v109_v41 }
  0xa0   :  { %707 = vrot.lane.b32.xlu1 %v1522_v5, %s1369_s2  ;;  %v484_v10 = vadd.f32 %v1478_v56, %v461_v2  ;;  %v287_v12 = vrot.slane %v227_v3, 1  ;;  %v428_v13 = vrot.slane %v368_v4, 2  ;;  %v184_v16 = vmul.f32 %v1465_v38, %v113_v46 }
  0xa1   :  { %v83_v14 = vpop.permute.xlu1 %82  ;;  %v499_v15 = vmax.f32 %v483_v6, 0.0  ;;  %v286_v17 = vsel %vm258_vm1, %v284_v61, %v285_v8  ;;  %v427_v22 = vsel %vm399_vm2, %v425_v7, %v426_v9  ;;  %v219_v24 = vmul.f32 %v1455_v28, %v79_v0 }
  0xa2   :  { %v87_v18 = vpop.permute.xlu0 %86  ;;  %v500_v19 = vmax.f32 %v484_v10, 0.0  ;;  %v325_v20 = vadd.f32 %v286_v17, %v183_v11  ;;  %v288_v21 = vsel %vm258_vm1, %v285_v8, %v287_v12  ;;  %v429_v29 = vsel %vm399_vm2, %v426_v9, %v428_v13 }
  0xa3   :  { %532 = vst.msk [vmem:[#allocation2 + $0x48] sm:$0xff] %vm511_vm0, %v499_v15  ;;  %v326_v23 = vadd.f32 %v288_v21, %v184_v16  ;;  %v1535_v26 = vld [vmem:[#allocation2 + $0x28] sm:$0xff]  ;;  %v360_v30 = vmul.f32 %v1458_v31, %v79_v0  ;;  %v220_v34 = vmul.f32 %v1455_v28, %v83_v14  ;;  %v361_v35 = vmul.f32 %v1458_v31, %v83_v14 }
  0xa4   :  { %533 = vst.msk [vmem:[#allocation2 + $0x50] sm:$0xff] %vm511_vm0, %v500_v19  ;;  %v466_v27 = vadd.f32 %v427_v22, %v325_v20  ;;  %709 = vrot.lane.b32.xlu0 %v1535_v26, %s1369_s2  ;;  %v179_v39 = vmul.f32 %v1465_v38, %v79_v0  ;;  %v221_v40 = vmul.f32 %v1455_v28, %v87_v18  ;;  %v274_v44 = vrot.slane %v219_v24, 1 }
  0xa5   :  { %v124_v32 = vpop.permute.xlu1 %123  ;;  %v467_v33 = vadd.f32 %v429_v29, %v326_v23  ;;  %v362_v41 = vmul.f32 %v1458_v31, %v87_v18  ;;  %v275_v45 = vrot.slane %v220_v34, 1  ;;  %v416_v46 = vrot.slane %v361_v35, 2 }
  0xa6   :  { %v1544_v36 = vld [vmem:[#allocation2 + $0x30] sm:$0xff]  ;;  %v489_v37 = vadd.f32 %v1478_v56, %v466_v27  ;;  %v128_v42 = vpop.permute.xlu0 %127  ;;  %v415_v48 = vrot.slane %v360_v30, 2  ;;  %v277_v49 = vrot.slane %v221_v40, 1  ;;  %v180_v53 = vmul.f32 %v1465_v38, %v83_v14 }
  0xa7   :  { %711 = vrot.lane.b32.xlu1 %v1544_v36, %s1369_s2  ;;  %v490_v43 = vadd.f32 %v1478_v56, %v467_v33  ;;  %v418_v50 = vrot.slane %v362_v41, 2  ;;  %v276_v54 = vsel %vm258_vm1, %v274_v44, %v275_v45  ;;  %v228_v55 = vmul.f32 %v1455_v28, %v124_v32 }
  0xa8   :  { %v505_v47 = vmax.f32 %v489_v37, 0.0  ;;  %v321_v57 = vadd.f32 %v276_v54, %v179_v39  ;;  %v278_v58 = vsel %vm258_vm1, %v275_v45, %v277_v49  ;;  %v369_v59 = vmul.f32 %v1458_v31, %v124_v32 }
  0xa9   :  { %v132_v51 = vpop.permute.xlu1 %131  ;;  %v506_v52 = vmax.f32 %v490_v43, 0.0  ;;  %v417_v61 = vsel %vm399_vm2, %v415_v48, %v416_v46  ;;  %v322_v62 = vadd.f32 %v278_v58, %v180_v53  ;;  %v289_v63 = vrot.slane %v228_v55, 1 }
  0xaa   :  { %538 = vst.msk [vmem:[#allocation2 + $0xa8] sm:$0xff] %vm511_vm0, %v505_v47  ;;  %v1559_v60 = vld [vmem:[#allocation2 + $0x48] sm:$0xff]  ;;  %v229_v0 = vmul.f32 %v1455_v28, %v128_v42  ;;  %v462_v3 = vadd.f32 %v417_v61, %v321_v57  ;;  %v419_v4 = vsel %vm399_vm2, %v416_v46, %v418_v50  ;;  %v370_v6 = vmul.f32 %v1458_v31, %v128_v42  ;;  %v94_v7 = vpop.permute.xlu0 %93 }
  0xab   :  { %539 = vst.msk [vmem:[#allocation2 + $0xb0] sm:$0xff] %vm511_vm0, %v506_v52  ;;  %713 = vrot.lane.b32.xlu0 %v1559_v60, %s1369_s2  ;;  %v1566_v2 = vld [vmem:[#allocation2 + $0x50] sm:$0xff]  ;;  %v463_v8 = vadd.f32 %v419_v4, %v322_v62  ;;  %v430_v9 = vrot.slane %v369_v59, 2  ;;  %v230_v11 = vmul.f32 %v1455_v28, %v132_v51  ;;  %v185_v14 = vmul.f32 %v1465_v38, %v124_v32 }
  0xac   :  { %715 = vrot.lane.b32.xlu1 %v1566_v2, %s1369_s2  ;;  %v290_v10 = vrot.slane %v229_v0, 1  ;;  %v485_v13 = vadd.f32 %v1478_v56, %v462_v3  ;;  %v431_v15 = vrot.slane %v370_v6, 2  ;;  %v371_v16 = vmul.f32 %v1458_v31, %v132_v51 }
  0xad   :  { %v98_v12 = vpop.permute.xlu1 %97  ;;  %v486_v17 = vadd.f32 %v1478_v56, %v463_v8  ;;  %v292_v19 = vrot.slane %v230_v11, 1  ;;  %v186_v21 = vmul.f32 %v1465_v38, %v128_v42  ;;  %v222_v34 = vmul.f32 %v1455_v28, %v94_v7 }
  0xae   :  { %v291_v18 = vsel %vm258_vm1, %v289_v63, %v290_v10  ;;  %v501_v20 = vmax.f32 %v485_v13, 0.0  ;;  %v433_v23 = vrot.slane %v371_v16, 2  ;;  %v432_v27 = vsel %vm399_vm2, %v430_v9, %v431_v15  ;;  %v102_v35 = vpop.permute.xlu0 %101 }
  0xaf   :  { %v327_v22 = vadd.f32 %v291_v18, %v185_v14  ;;  %v502_v24 = vmax.f32 %v486_v17, 0.0  ;;  %v293_v29 = vsel %vm258_vm1, %v290_v10, %v292_v19  ;;  %v363_v39 = vmul.f32 %v1458_v31, %v94_v7 }
  0xb0   :  { %534 = vst.msk [vmem:[#allocation2 + $0x68] sm:$0xff] %vm511_vm0, %v501_v20  ;;  %v328_v33 = vadd.f32 %v293_v29, %v186_v21  ;;  %v434_v37 = vsel %vm399_vm2, %v431_v15, %v433_v23  ;;  %v223_v44 = vmul.f32 %v1455_v28, %v98_v12  ;;  %v181_v45 = vmul.f32 %v1465_v38, %v94_v7 }
  0xb1   :  { %v1581_v30 = vld [vmem:[#allocation2 + $0xa8] sm:$0xff]  ;;  %v468_v32 = vadd.f32 %v432_v27, %v327_v22  ;;  %535 = vst.msk [vmem:[#allocation2 + $0x70] sm:$0xff] %vm511_vm0, %v502_v24  ;;  %v139_v40 = vpop.permute.xlu1 %138  ;;  %v364_v46 = vmul.f32 %v1458_v31, %v98_v12  ;;  %v224_v47 = vmul.f32 %v1455_v28, %v102_v35  ;;  %v365_v48 = vmul.f32 %v1458_v31, %v102_v35 }
  0xb2   :  { %725 = vrot.lane.b32.xlu0 %v1581_v30, %s1369_s2  ;;  %v1590_v41 = vld [vmem:[#allocation2 + $0xb0] sm:$0xff]  ;;  %v469_v43 = vadd.f32 %v434_v37, %v328_v33  ;;  %v279_v51 = vrot.slane %v222_v34, 1  ;;  %v280_v52 = vrot.slane %v223_v44, 1  ;;  %v420_v53 = vrot.slane %v363_v39, 2  ;;  %v143_v63 = vpop.permute.xlu0 %142 }
  0xb3   :  { %v491_v42 = vadd.f32 %v1478_v56, %v468_v32  ;;  %v421_v54 = vrot.slane %v364_v46, 2  ;;  %v282_v55 = vrot.slane %v224_v47, 1  ;;  %v423_v57 = vrot.slane %v365_v48, 2 }
  0xb4   :  { %v492_v50 = vadd.f32 %v1478_v56, %v469_v43  ;;  %v182_v59 = vmul.f32 %v1465_v38, %v98_v12  ;;  %v281_v61 = vsel %vm258_vm1, %v279_v51, %v280_v52  ;;  %v231_v62 = vmul.f32 %v1455_v28, %v139_v40 }
  0xb5   :  { %v507_v49 = vmax.f32 %v491_v42, 0.0  ;;  %v323_v0 = vadd.f32 %v281_v61, %v181_v45  ;;  %v283_v3 = vsel %vm258_vm1, %v280_v52, %v282_v55  ;;  %v372_v4 = vmul.f32 %v1458_v31, %v139_v40  ;;  %v147_v6 = vpop.permute.xlu1 %146 }
  0xb6   :  { %727 = vrot.lane.b32.xlu0 %v1590_v41, %s1369_s2  ;;  %v508_v58 = vmax.f32 %v492_v50, 0.0  ;;  %v422_v8 = vsel %vm399_vm2, %v420_v53, %v421_v54  ;;  %v324_v9 = vadd.f32 %v283_v3, %v182_v59  ;;  %v424_v10 = vsel %vm399_vm2, %v421_v54, %v423_v57 }
  0xb7   :  { %540 = vst.msk [vmem:[#allocation2 + $0xc8] sm:$0xff] %vm511_vm0, %v507_v49  ;;  %v1607_v7 = vld [vmem:[#allocation2 + $0x68] sm:$0xff]  ;;  %v464_v12 = vadd.f32 %v422_v8, %v323_v0  ;;  %v294_v13 = vrot.slane %v231_v62, 1  ;;  %v232_v14 = vmul.f32 %v1455_v28, %v143_v63  ;;  %v373_v15 = vmul.f32 %v1458_v31, %v143_v63 }
  0xb8   :  { %541 = vst.msk [vmem:[#allocation2 + $0xd0] sm:$0xff] %vm511_vm0, %v508_v58  ;;  %717 = vrot.lane.b32.xlu1 %v1607_v7, %s1369_s2  ;;  %v1614_v11 = vld [vmem:[#allocation2 + $0x70] sm:$0xff]  ;;  %v465_v16 = vadd.f32 %v424_v10, %v324_v9  ;;  %v233_v17 = vmul.f32 %v1455_v28, %v147_v6  ;;  %v374_v18 = vmul.f32 %v1458_v31, %v147_v6  ;;  %v435_v20 = vrot.slane %v372_v4, 2  ;;  %v834_v6 = vld [vmem:[%s1937_s3] sm:$0xff]  ;;  %v835_v8 = vld [vmem:[%s1937_s3 + $0x8] sm:$0xff] }
  0xb9   :  { %v487_v19 = vadd.f32 %v1478_v56, %v464_v12  ;;  %v295_v21 = vrot.slane %v232_v14, 1  ;;  %v436_v22 = vrot.slane %v373_v15, 2  ;;  %v187_v24 = vmul.f32 %v1465_v38, %v139_v40 }
  0xba   :  { %719 = vrot.lane.b32.xlu0 %v1614_v11, %s1369_s2  ;;  %v488_v23 = vadd.f32 %v1478_v56, %v465_v16  ;;  %v297_v27 = vrot.slane %v233_v17, 1  ;;  %v438_v29 = vrot.slane %v374_v18, 2  ;;  %v188_v33 = vmul.f32 %v1465_v38, %v143_v63  ;;  %v836_v17 = vld [vmem:[%s1937_s3 + $0x10] sm:$0xff]  ;;  %v547_v18 = vld [vmem:[#allocation2 + $0x18] sm:$0xff]  ;;  %s1370_s3 = smov 16  }
  0xbb   :  { %v503_v32 = vmax.f32 %v487_v19, 0.0  ;;  %v296_v34 = vsel %vm258_vm1, %v294_v13, %v295_v21  ;;  %v437_v39 = vsel %vm399_vm2, %v435_v20, %v436_v22  ;;  %v602_v44 = vrot.slane %v1515_v1, 7 }
  0xbc   :  { %v504_v28 = vmax.f32 %v488_v23, 0.0  ;;  %v329_v31 = vadd.f32 %v296_v34, %v187_v24  ;;  %v298_v37 = vsel %vm258_vm1, %v295_v21, %v297_v27  ;;  %v439_v43 = vsel %vm399_vm2, %v436_v22, %v438_v29  ;;  %v551_v29 = vld [vmem:[#allocation2 + $0x38] sm:$0xff] }
  0xbd   :  { %536 = vst.msk [vmem:[#allocation2 + $0x88] sm:$0xff] %vm511_vm0, %v503_v32  ;;  %v330_v40 = vadd.f32 %v298_v37, %v188_v33  ;;  %v604_v45 = vrot.slane %v1522_v5, 7  ;;  %v609_v46 = vrot.slane %v1544_v36, 7  ;;  %v612_v48 = vrot.slane %v1559_v60, 7  ;;  %v555_v37 = vld [vmem:[#allocation2 + $0x58] sm:$0xff] }
  0xbe   :  { %v1627_v35 = vld [vmem:[#allocation2 + $0xc8] sm:$0xff]  ;;  %537 = vst.msk [vmem:[#allocation2 + $0x90] sm:$0xff] %vm511_vm0, %v504_v28  ;;  %v470_v38 = vadd.f32 %v437_v39, %v329_v31  ;;  %v614_v49 = vrot.slane %v1566_v2, 7  ;;  %v629_v51 = vrot.slane %v1590_v41, 7  ;;  %v607_v52 = vrot.slane %v1535_v26, 7 }
  0xbf   :  { %729 = vrot.lane.b32.xlu0 %v1627_v35, %s1369_s2  ;;  %v1634_v42 = vld [vmem:[#allocation2 + $0xd0] sm:$0xff]  ;;  %v471_v47 = vadd.f32 %v439_v43, %v330_v40  ;;  %v617_v54 = vrot.slane %v1607_v7, 7  ;;  %v619_v55 = vrot.slane %v1614_v11, 7  ;;  %v627_v57 = vrot.slane %v1581_v30, 7 }
  0xc0   :  { %v493_v50 = vadd.f32 %v1478_v56, %v470_v38  ;;  %v634_v59 = vrot.slane %v1634_v42, 7  ;;  %v1656_v62 = vsel %vm600_vm3, %v602_v44, %v604_v45  ;;  %v1661_v63 = vsel %vm600_vm3, %v607_v52, %v609_v46  ;;  %v567_v45 = vld [vmem:[#allocation2 + $0xb8] sm:$0xff] }
  0xc1   :  { %v494_v53 = vadd.f32 %v1478_v56, %v471_v47  ;;  %v632_v56 = vrot.slane %v1627_v35, 7  ;;  %v1670_v3 = vsel %vm600_vm3, %v612_v48, %v614_v49  ;;  %v1675_v4 = vsel %vm600_vm3, %v627_v57, %v629_v51 }
  0xc2   :  { %v509_v58 = vmax.f32 %v493_v50, 0.0  ;;  %v1692_v12 = vsel %vm600_vm3, %v617_v54, %v619_v55  ;;  %v1318_v15 = vpack.c.bf16 %v835_v8, %v834_v6  ;;  %v665_v19 = vrot.slane %v1515_v1, 1  ;;  %v559_v6 = vld [vmem:[#allocation2 + $0x78] sm:$0xff] }
  0xc3   :  { %731 = vrot.lane.b32.xlu0 %v1634_v42, %s1369_s2  ;;  %v510_v61 = vmax.f32 %v494_v53, 0.0  ;;  %v1700_v14 = vsel %vm600_vm3, %v632_v56, %v634_v59  ;;  %v666_v20 = vrot.slane %v1522_v5, 1  ;;  %v668_v23 = vrot.slane %v547_v18, 1 }
  0xc4   :  { %542 = vst.msk [vmem:[#allocation2 + $0xe8] sm:$0xff] %vm511_vm0, %v509_v58  ;;  %v1665_v0 = vld [vmem:[#allocation2 + $0x88] sm:$0xff]  ;;  %1319 = vmatprep.subr.bf16.mxu0 %v1318_v15  ;;  %1325 = vmatprep.subr.bf16.mxu1 %v1318_v15  ;;  %v671_v5 = vrot.slane %v1544_v36, 1  ;;  %v673_v28 = vrot.slane %v551_v29, 1  ;;  %v670_v31 = vrot.slane %v1535_v26, 1  ;;  %v675_v36 = vrot.slane %v1559_v60, 1 }
  0xc5   :  { %543 = vst.msk [vmem:[#allocation2 + $0xf0] sm:$0xff] %vm511_vm0, %v510_v61  ;;  %721 = vrot.lane.b32.xlu1 %v1665_v0, %s1369_s2  ;;  %v622_v9 = vrot.slane %v1665_v0, 7  ;;  %v1687_v10 = vld [vmem:[#allocation2 + $0x90] sm:$0xff]  ;;  %1321 = vmatpush3.bf16.msra.mxu0 %v1318_v15  ;;  %v667_v32 = vsel %vm258_vm1, %v665_v19, %v666_v20  ;;  %v669_v34 = vsel %vm258_vm1, %v666_v20, %v668_v23  ;;  %v676_v39 = vrot.slane %v1566_v2, 1  ;;  %v571_v2 = vld [vmem:[#allocation2 + $0xd8] sm:$0xff] }
  0xc6   :  { %v624_v13 = vrot.slane %v1687_v10, 7  ;;  %1327 = vmatpush3.bf16.msra.mxu1 %v1318_v15  ;;  %1285 = vmatprep.subr.mxu0 %v836_v17  ;;  %v672_v40 = vsel %vm258_vm1, %v670_v31, %v671_v5  ;;  %v674_v38 = vsel %vm258_vm1, %v671_v5, %v673_v28  ;;  %v678_v43 = vrot.slane %v555_v37, 1 }
  0xc7   :  { %723 = vrot.lane.b32.xlu0 %v1687_v10, %s1369_s2  ;;  %1326 = vmatprep.subr.mxu1 %v836_v17  ;;  %v691_v46 = vrot.slane %v1590_v41, 1  ;;  %v677_v47 = vsel %vm258_vm1, %v675_v36, %v676_v39  ;;  %v693_v49 = vrot.slane %v567_v45, 1  ;;  %v690_v51 = vrot.slane %v1581_v30, 1 }
  0xc8   :  { %v1705_v16 = vsel %vm600_vm3, %v622_v9, %v624_v13  ;;  %v679_v50 = vsel %vm258_vm1, %v676_v39, %v678_v43  ;;  %v696_v53 = vrot.slane %v1634_v42, 1  ;;  %v698_v58 = vrot.slane %v571_v2, 1 }
  0xc9   :  { %1286 = vmatpush3.msra.mxu0 %v836_v17  ;;  %v694_v55 = vsel %vm258_vm1, %v691_v46, %v693_v49  ;;  %v680_v59 = vrot.slane %v1607_v7, 1  ;;  %v681_v41 = vrot.slane %v1614_v11, 1  ;;  %v692_v61 = vsel %vm258_vm1, %v690_v51, %v691_v46  ;;  %v544_v51 = vld [vmem:[#allocation2] sm:$0xff] }
  0xca   :  { %1328 = vmatpush3.msra.mxu1 %v836_v17  ;;  %v699_v13 = vsel %vm258_vm1, %v696_v53, %v698_v58  ;;  %v683_v15 = vrot.slane %v559_v6, 1  ;;  %v695_v19 = vrot.slane %v1627_v35, 1  ;;  %v685_v20 = vrot.slane %v1665_v0, 1  ;;  %v548_v58 = vld [vmem:[#allocation2 + $0x20] sm:$0xff] }
  0xcb   :  { %v1712_v21 = vld [vmem:[#allocation2 + $0xe8] sm:$0xff]  ;;  %v682_v42 = vsel %vm258_vm1, %v680_v59, %v681_v41  ;;  %v606_v6 = vrot.slane %v548_v58, 7  ;;  %v572_v58 = vld [vmem:[#allocation2 + $0xe0] sm:$0xff] }
  0xcc   :  { %733 = vrot.lane.b32.xlu0 %v1712_v21, %s1369_s2  ;;  %v1716_v22 = vld [vmem:[#allocation2 + $0xf0] sm:$0xff]  ;;  %v637_v24 = vrot.slane %v1712_v21, 7  ;;  %v700_v17 = vrot.slane %v1712_v21, 1  ;;  %v684_v18 = vsel %vm258_vm1, %v681_v41, %v683_v15  ;;  %v697_v23 = vsel %vm258_vm1, %v695_v19, %v696_v53  ;;  %v560_v7 = vld [vmem:[#allocation2 + $0x80] sm:$0xff] }
  0xcd   :  { %735 = vrot.lane.b32.xlu1 %v1716_v22, %s1369_s2  ;;  %v639_v27 = vrot.slane %v1716_v22, 7  ;;  %v701_v8 = vrot.slane %v1716_v22, 1  ;;  %v686_v22 = vrot.slane %v1687_v10, 1  ;;  %v608_v1 = vsel %vm600_vm3, %v606_v6, %v607_v52 }
  0xcf   :  { %v1727_v33 = vsel %vm600_vm3, %v637_v24, %v639_v27  ;;  %v702_v11 = vsel %vm258_vm1, %v700_v17, %v701_v8  ;;  %v563_v27 = vld [vmem:[#allocation2 + $0x98] sm:$0xff]  ;;  %v687_v29 = vsel %vm258_vm1, %v685_v20, %v686_v22 }
  0xd0   :  { %753 = vrot.lane.b32.xlu0 %v667_v32, %s1370_s3  ;;  %v688_v5 = vrot.slane %v563_v27, 1  ;;  %v575_v32 = vld [vmem:[#allocation2 + $0xf8] sm:$0xff] }
  0xd1   :  { %755 = vrot.lane.b32.xlu1 %v669_v34, %s1370_s3  ;;  %v703_v28 = vrot.slane %v575_v32, 1 }
  0xd2   :  { %v689_v34 = vsel %vm258_vm1, %v686_v22, %v688_v5  ;;  %v564_v22 = vld [vmem:[#allocation2 + $0xa0] sm:$0xff] }
  0xd3   :  { %v704_v31 = vsel %vm258_vm1, %v701_v8, %v703_v28  ;;  %v626_v5 = vrot.slane %v564_v22, 7 }
  0xd4   :  { %757 = vrot.lane.b32.xlu0 %v672_v40, %s1370_s3 }
  0xd5   :  { %759 = vrot.lane.b32.xlu1 %v674_v38, %s1370_s3  ;;  %v628_v60 = vsel %vm600_vm3, %v626_v5, %v627_v57 }
  0xd8   :  { %761 = vrot.lane.b32.xlu0 %v677_v47, %s1370_s3 }
  0xd9   :  { %763 = vrot.lane.b32.xlu1 %v679_v50, %s1370_s3 }
  0xdc   :  { %775 = vrot.lane.b32.xlu0 %v694_v55, %s1370_s3  ;;  %v601_v55 = vrot.slane %v544_v51, 7  ;;  %v568_v51 = vld [vmem:[#allocation2 + $0xc0] sm:$0xff] }
  0xdd   :  { %773 = vrot.lane.b32.xlu1 %v692_v61, %s1370_s3 }
  0xde   :  { %v603_v61 = vsel %vm600_vm3, %v601_v55, %v602_v44 }
  0xe0   :  { %779 = vrot.lane.b32.xlu0 %v699_v13, %s1370_s3  ;;  %v552_v13 = vld [vmem:[#allocation2 + $0x40] sm:$0xff] }
  0xe1   :  { %765 = vrot.lane.b32.xlu1 %v682_v42, %s1370_s3  ;;  %v611_v44 = vrot.slane %v552_v13, 7  ;;  %v621_v13 = vrot.slane %v560_v7, 7 }
  0xe3   :  { %v613_v26 = vsel %vm600_vm3, %v611_v44, %v612_v48  ;;  %v1126_v44 = vld [vmem:[%s1939_s5] sm:$0xff] }
  0xe4   :  { %781 = vrot.lane.b32.xlu0 %v702_v11, %s1370_s3 }
  0xe5   :  { %767 = vrot.lane.b32.xlu1 %v684_v18, %s1370_s3 }
  0xe9   :  { %777 = vrot.lane.b32.xlu1 %v697_v23, %s1370_s3 }
  0xed   :  { %769 = vrot.lane.b32.xlu1 %v687_v29, %s1370_s3 }
  0xf1   :  { %771 = vrot.lane.b32.xlu1 %v689_v34, %s1370_s3  ;;  %v556_v34 = vld [vmem:[#allocation2 + $0x60] sm:$0xff] }
  0xf2   :  { %v616_v48 = vrot.slane %v556_v34, 7 }
  0xf4   :  { %v618_v30 = vsel %vm600_vm3, %v616_v48, %v617_v54  ;;  %v636_v54 = vrot.slane %v572_v58, 7 }
  0xf5   :  { %783 = vrot.lane.b32.xlu1 %v704_v31, %s1370_s3 }
 0x111   :  { %v706_v10 = vpop.permute.xlu0 %705 }
 0x112   :  { %v708_v38 = vpop.permute.xlu1 %707  ;;  %v801_v8 = vsel %vm511_vm0, %v603_v61, %v706_v10 }
 0x113   :  { %v802_v15 = vsel %vm511_vm0, %v1656_v62, %v708_v38 }
 0x116   :  { %v710_v37 = vpop.permute.xlu0 %709 }
 0x117   :  { %v803_v19 = vsel %vm511_vm0, %v608_v1, %v710_v37 }
 0x119   :  { %v712_v45 = vpop.permute.xlu1 %711 }
 0x11a   :  { %v804_v62 = vsel %vm511_vm0, %v1661_v63, %v712_v45 }
 0x11d   :  { %v714_v36 = vpop.permute.xlu0 %713 }
 0x11e   :  { %v716_v49 = vpop.permute.xlu1 %715  ;;  %v805_v52 = vsel %vm511_vm0, %v613_v26, %v714_v36 }
 0x11f   :  { %v806_v63 = vsel %vm511_vm0, %v1670_v3, %v716_v49 }
 0x124   :  { %v726_v39 = vpop.permute.xlu0 %725 }
 0x125   :  { %v811_v36 = vsel %vm511_vm0, %v628_v60, %v726_v39 }
 0x128   :  { %v728_v40 = vpop.permute.xlu0 %727 }
 0x129   :  { %v812_v3 = vsel %vm511_vm0, %v1675_v4, %v728_v40  ;;  %v631_v40 = vrot.slane %v568_v51, 7 }
 0x12a   :  { %v718_v50 = vpop.permute.xlu1 %717 }
 0x12b   :  { %v807_v57 = vsel %vm511_vm0, %v618_v30, %v718_v50  ;;  %v633_v50 = vsel %vm600_vm3, %v631_v40, %v632_v56 }
 0x12c   :  { %v1773_v43 = vpop.permute.xlu0 %719 }
 0x12d   :  { %v808_v61 = vsel %vm511_vm0, %v1692_v12, %v1773_v43  ;;  %v638_v43 = vsel %vm600_vm3, %v636_v54, %v637_v24 }
 0x131   :  { %v1775_v46 = vpop.permute.xlu0 %729 }
 0x135   :  { %v1777_v47 = vpop.permute.xlu0 %731 }
 0x136   :  { %v814_v12 = vsel %vm511_vm0, %v1700_v14, %v1777_v47 }
 0x137   :  { %v1781_v53 = vpop.permute.xlu1 %721 }
 0x139   :  { %v1779_v2 = vpop.permute.xlu0 %723 }
 0x13a   :  { %v810_v0 = vsel %vm511_vm0, %v1705_v16, %v1779_v2  ;;  %v1127_v16 = vld [vmem:[%s1939_s5 + $0x8] sm:$0xff]  ;;  %v1371_v2 = vmov 0.0|0.0  }
 0x13b   :  { %1322 = vmatprep.subr.bf16.mxu1 %v1371_v2 }
 0x13e   :  { %v1783_v59 = vpop.permute.xlu0 %733 }
 0x13f   :  { %v1785_v41 = vpop.permute.xlu1 %735  ;;  %v815_v35 = vsel %vm511_vm0, %v638_v43, %v1783_v59 }
 0x142   :  { %v754_v42 = vpop.permute.xlu0 %753 }
 0x143   :  { %v818_v17 = vsel %vm817_vm4, %v801_v8, %v754_v42  ;;  %v756_v11 = vpop.permute.xlu1 %755  ;;  %v813_v42 = vsel %vm511_vm0, %v633_v50, %v1775_v46  ;;  %v623_v46 = vsel %vm600_vm3, %v621_v13, %v622_v9 }
 0x144   :  { %1287 = vmatprep.mubr.msk.f32.mxu0 %vm844_vm5, %v818_v17  ;;  %v819_v18 = vsel %vm817_vm4, %v802_v15, %v756_v11  ;;  %v809_v14 = vsel %vm511_vm0, %v623_v46, %v1781_v53  ;;  %v816_v53 = vsel %vm511_vm0, %v1727_v33, %v1785_v41  ;;  %v1884_v33 = vld [vmem:[%s1938_s4] ss:$0 sm:$0xff] }
 0x145   :  { %1288 = vmatmul.mubr.msk.f32.vlgmr.msra.gmra.mrb[0].mxu0 %vm844_vm5, %v819_v18 }
 0x146   :  { %v758_v20 = vpop.permute.xlu0 %757 }
 0x147   :  { %v820_v23 = vsel %vm817_vm4, %v803_v19, %v758_v20  ;;  %v760_v27 = vpop.permute.xlu1 %759  ;;  %v1323_v19 = vpack.c.bf16 %v1127_v16, %v1126_v44 }
 0x148   :  { %1290 = vmatprep.mubr.msk.f32.mxu0 %vm844_vm5, %v820_v23  ;;  %v821_v29 = vsel %vm817_vm4, %v804_v62, %v760_v27 }
 0x149   :  { %1291 = vmatmul.mubr.msk.f32.gmra.mrb[2].mxu0 %vm844_vm5, %v821_v29 }
 0x14a   :  { %v762_v32 = vpop.permute.xlu0 %761 }
 0x14b   :  { %v822_v28 = vsel %vm817_vm4, %v805_v52, %v762_v32  ;;  %v764_v31 = vpop.permute.xlu1 %763 }
 0x14c   :  { %1293 = vmatprep.mubr.msk.f32.mxu0 %vm844_vm5, %v822_v28  ;;  %v823_v10 = vsel %vm817_vm4, %v806_v63, %v764_v31 }
 0x14d   :  { %1294 = vmatmul.mubr.msk.f32.gmra.mrb[4].mxu0 %vm844_vm5, %v823_v10 }
 0x14e   :  { %v776_v37 = vpop.permute.xlu0 %775 }
 0x14f   :  { %v774_v38 = vpop.permute.xlu1 %773  ;;  %v829_v49 = vsel %vm817_vm4, %v812_v3, %v776_v37 }
 0x150   :  { %v828_v45 = vsel %vm817_vm4, %v811_v36, %v774_v38 }
 0x151   :  { %1302 = vmatprep.mubr.msk.f32.mxu1 %vm844_vm5, %v828_v45 }
 0x152   :  { %1303 = vmatmul.mubr.msk.f32.vlgmr.msra.gmra.mrb[0].mxu1 %vm844_vm5, %v829_v49  ;;  %v780_v4 = vpop.permute.xlu0 %779 }
 0x153   :  { %v766_v39 = vpop.permute.xlu1 %765  ;;  %v831_v56 = vsel %vm817_vm4, %v814_v12, %v780_v4  ;;  %1324 = vmatpush3.bf16.msra.mxu1 %v1323_v19 }
 0x154   :  { %v824_v55 = vsel %vm817_vm4, %v807_v57, %v766_v39 }
 0x155   :  { %1296 = vmatprep.mubr.msk.f32.mxu0 %vm844_vm5, %v824_v55 }
 0x156   :  { %v782_v15 = vpop.permute.xlu0 %781 }
 0x157   :  { %v768_v6 = vpop.permute.xlu1 %767  ;;  %v832_v18 = vsel %vm817_vm4, %v815_v35, %v782_v15 }
 0x158   :  { %v825_v8 = vsel %vm817_vm4, %v808_v61, %v768_v6 }
 0x159   :  { %1297 = vmatmul.mubr.msk.f32.gmra.mrb[6].mxu0 %vm844_vm5, %v825_v8 }
 0x15b   :  { %v778_v17 = vpop.permute.xlu1 %777 }
 0x15c   :  { %v830_v11 = vsel %vm817_vm4, %v813_v42, %v778_v17 }
 0x15d   :  { %1305 = vmatprep.mubr.msk.f32.mxu1 %vm844_vm5, %v830_v11 }
 0x15e   :  { %1306 = vmatmul.mubr.msk.f32.gmra.mrb[2].mxu1 %vm844_vm5, %v831_v56 }
 0x15f   :  { %1308 = vmatprep.mubr.msk.f32.mxu1 %vm844_vm5, %v832_v18  ;;  %v770_v21 = vpop.permute.xlu1 %769 }
 0x160   :  { %v826_v24 = vsel %vm817_vm4, %v809_v14, %v770_v21 }
 0x161   :  { %1299 = vmatprep.mubr.msk.f32.mxu0 %vm844_vm5, %v826_v24 }
 0x163   :  { %v772_v47 = vpop.permute.xlu1 %771 }
 0x164   :  { %v827_v9 = vsel %vm817_vm4, %v810_v0, %v772_v47 }
 0x165   :  { %1300 = vmatmul.mubr.msk.f32.gmra.mrb[8].mxu0 %vm844_vm5, %v827_v9 }
 0x167   :  { %v784_v59 = vpop.permute.xlu1 %783 }
 0x168   :  { %v833_v1 = vsel %vm817_vm4, %v816_v53, %v784_v59 }
 0x169   :  { %1309 = vmatmul.mubr.msk.f32.gmra.mrb[4].mxu1 %vm844_vm5, %v833_v1 }
 0x16a   :  { %1315 = vmatprep.mubr.msk.f32.mxu1 %vm1372_vm6, %v1368_v25 }
 0x218   :  { %v1289_v41 = vpop.f32.mrb[0].mxu0 }
 0x219   :  { %v965_v20 = vadd.f32 %v1289_v41, %v1884_v33  ;;  %v959_v62 = vpop.f32.mrb[1].mxu0 }
 0x21a   :  { %v960_v22 = vadd.f32 %v1884_v33, %v959_v62 }
 0x21b   :  { %v1039_v23 = vmax.f32 %v965_v20, 0.0 }
 0x21c   :  { %v1038_v27 = vmax.f32 %v960_v22, 0.0  ;;  %v1292_v29 = vpop.f32.mrb[2].mxu0 }
 0x21d   :  { %v1055_v26 = vsel %vm817_vm4, %v1039_v23, 0.0  ;;  %v975_v52 = vadd.f32 %v1292_v29, %v1884_v33  ;;  %v969_v25 = vpop.f32.mrb[3].mxu0 }
 0x21e   :  { %v1054_v5 = vsel %vm817_vm4, %v1038_v27, 0.0  ;;  %v970_v32 = vadd.f32 %v1884_v33, %v969_v25 }
 0x21f   :  { %v1056_v63 = vadd.f32 %v1055_v26, %v1054_v5  ;;  %v1041_v34 = vmax.f32 %v975_v52, 0.0 }
 0x220   :  { %v1040_v28 = vmax.f32 %v970_v32, 0.0  ;;  %v1295_v31 = vpop.f32.mrb[4].mxu0 }
 0x221   :  { %v1057_v10 = vrot.slane %v1056_v63, 4  ;;  %v1064_v60 = vsel %vm817_vm4, %v1041_v34, 0.0  ;;  %v985_v48 = vadd.f32 %v1295_v31, %v1884_v33  ;;  %v979_v37 = vpop.f32.mrb[5].mxu0 }
 0x222   :  { %v1063_v36 = vsel %vm817_vm4, %v1040_v28, 0.0  ;;  %v980_v38 = vadd.f32 %v1884_v33, %v979_v37 }
 0x223   :  { %v1058_v3 = vadd.f32 %v1057_v10, %v1056_v63  ;;  %v1065_v45 = vadd.f32 %v1064_v60, %v1063_v36  ;;  %v1043_v49 = vmax.f32 %v985_v48, 0.0 }
 0x224   :  { %v1042_v30 = vmax.f32 %v980_v38, 0.0 }
 0x225   :  { %v1059_v57 = vrot.slane %v1058_v3, 2  ;;  %v1066_v51 = vrot.slane %v1065_v45, 4  ;;  %v1073_v39 = vsel %vm817_vm4, %v1043_v49, 0.0  ;;  %v1304_v55 = vpop.f32.mrb[0].mxu1 }
 0x226   :  { %v1072_v58 = vsel %vm817_vm4, %v1042_v30, 0.0  ;;  %v1015_v4 = vadd.f32 %v1304_v55, %v1884_v33  ;;  %v1009_v40 = vpop.f32.mrb[1].mxu1 }
 0x227   :  { %v1060_v61 = vadd.f32 %v1059_v57, %v1058_v3  ;;  %v1067_v7 = vadd.f32 %v1066_v51, %v1065_v45  ;;  %v1074_v6 = vadd.f32 %v1073_v39, %v1072_v58  ;;  %v1010_v54 = vadd.f32 %v1884_v33, %v1009_v40 }
 0x228   :  { %v1049_v8 = vmax.f32 %v1015_v4, 0.0 }
 0x229   :  { %v1068_v50 = vrot.slane %v1067_v7, 2  ;;  %v1075_v13 = vrot.slane %v1074_v6, 4  ;;  %v1048_v42 = vmax.f32 %v1010_v54, 0.0  ;;  %v1061_v17 = vrot.slane %v1060_v61, 1 }
 0x22a   :  { %v1100_v15 = vsel %vm817_vm4, %v1049_v8, 0.0 }
 0x22b   :  { %v1069_v12 = vadd.f32 %v1068_v50, %v1067_v7  ;;  %v1076_v43 = vadd.f32 %v1075_v13, %v1074_v6  ;;  %v1099_v11 = vsel %vm817_vm4, %v1048_v42, 0.0  ;;  %v1062_v0 = vadd.f32 %v1061_v17, %v1060_v61 }
 0x22c   :  { %v1101_v35 = vadd.f32 %v1100_v15, %v1099_v11  ;;  %v1298_v56 = vpop.f32.mrb[6].mxu0 }
 0x22d   :  { %v1070_v46 = vrot.slane %v1069_v12, 1  ;;  %v1077_v18 = vrot.slane %v1076_v43, 2  ;;  %v995_v14 = vadd.f32 %v1298_v56, %v1884_v33  ;;  %v989_v21 = vpop.f32.mrb[7].mxu0 }
 0x22e   :  { %v990_v24 = vadd.f32 %v1884_v33, %v989_v21  ;;  %v1102_v63 = vrot.slane %v1101_v35, 4 }
 0x22f   :  { %v1071_v47 = vadd.f32 %v1070_v46, %v1069_v12  ;;  %v1078_v9 = vadd.f32 %v1077_v18, %v1076_v43  ;;  %v1045_v53 = vmax.f32 %v995_v14, 0.0 }
 0x230   :  { %v1044_v59 = vmax.f32 %v990_v24, 0.0  ;;  %v1103_v3 = vadd.f32 %v1102_v63, %v1101_v35 }
 0x231   :  { %v1143_v1 = vsel %vm159_vm7, %v1071_v47, %v1062_v0  ;;  %v1079_v44 = vrot.slane %v1078_v9, 1  ;;  %v1082_v16 = vsel %vm817_vm4, %v1045_v53, 0.0  ;;  %v1307_v2 = vpop.f32.mrb[2].mxu1 }
 0x232   :  { %v1081_v19 = vsel %vm817_vm4, %v1044_v59, 0.0  ;;  %v1025_v41 = vadd.f32 %v1307_v2, %v1884_v33  ;;  %v1019_v20 = vpop.f32.mrb[3].mxu1  ;;  %v1104_v6 = vrot.slane %v1103_v3, 2 }
 0x233   :  { %v1080_v62 = vadd.f32 %v1079_v44, %v1078_v9  ;;  %v1083_v22 = vadd.f32 %v1082_v16, %v1081_v19  ;;  %v1020_v23 = vadd.f32 %v1884_v33, %v1019_v20 }
 0x234   :  { %v1051_v27 = vmax.f32 %v1025_v41, 0.0  ;;  %v1105_v43 = vadd.f32 %v1104_v6, %v1103_v3  ;;  %v1257_v41 = vld [vmem:[%s1940_s6] ss:$0 sm:$0xff] }
 0x235   :  { %v1144_v29 = vsel %vm160_vm8, %v1080_v62, %v1143_v1  ;;  %v1084_v26 = vrot.slane %v1083_v22, 4  ;;  %v1050_v52 = vmax.f32 %v1020_v23, 0.0 }
 0x236   :  { %v1109_v25 = vsel %vm817_vm4, %v1051_v27, 0.0  ;;  %v1106_v18 = vrot.slane %v1105_v43, 1 }
 0x237   :  { %v1085_v5 = vadd.f32 %v1084_v26, %v1083_v22  ;;  %v1108_v32 = vsel %vm817_vm4, %v1050_v52, 0.0 }
 0x238   :  { %v1110_v34 = vadd.f32 %v1109_v25, %v1108_v32  ;;  %v1301_v28 = vpop.f32.mrb[8].mxu0  ;;  %v1107_v9 = vadd.f32 %v1106_v18, %v1105_v43 }
 0x239   :  { %v1086_v31 = vrot.slane %v1085_v5, 2  ;;  %v1005_v10 = vadd.f32 %v1301_v28, %v1884_v33  ;;  %v999_v60 = vpop.f32.mrb[9].mxu0 }
 0x23a   :  { %v1111_v48 = vrot.slane %v1110_v34, 4  ;;  %v1000_v37 = vadd.f32 %v1884_v33, %v999_v60 }
 0x23b   :  { %v1087_v36 = vadd.f32 %v1086_v31, %v1085_v5  ;;  %v1047_v38 = vmax.f32 %v1005_v10, 0.0 }
 0x23c   :  { %v1046_v45 = vmax.f32 %v1000_v37, 0.0  ;;  %v1310_v49 = vpop.f32.mrb[4].mxu1  ;;  %v1112_v57 = vadd.f32 %v1111_v48, %v1110_v34 }
 0x23d   :  { %v1088_v30 = vrot.slane %v1087_v36, 1  ;;  %v1091_v51 = vsel %vm817_vm4, %v1047_v38, 0.0  ;;  %v1035_v39 = vadd.f32 %v1310_v49, %v1884_v33  ;;  %v1029_v55 = vpop.f32.mrb[5].mxu1 }
 0x23e   :  { %v1090_v58 = vsel %vm817_vm4, %v1046_v45, 0.0  ;;  %v1030_v4 = vadd.f32 %v1884_v33, %v1029_v55  ;;  %v1113_v50 = vrot.slane %v1112_v57, 2 }
 0x23f   :  { %v1089_v40 = vadd.f32 %v1088_v30, %v1087_v36  ;;  %v1092_v61 = vadd.f32 %v1091_v51, %v1090_v58  ;;  %v1053_v7 = vmax.f32 %v1035_v39, 0.0 }
 0x240   :  { %v1052_v54 = vmax.f32 %v1030_v4, 0.0  ;;  %v1114_v11 = vadd.f32 %v1113_v50, %v1112_v57 }
 0x241   :  { %v1145_v8 = vsel %vm162_vm9, %v1089_v40, %v1144_v29  ;;  %v1093_v13 = vrot.slane %v1092_v61, 4  ;;  %v1118_v42 = vsel %vm817_vm4, %v1053_v7, 0.0 }
 0x242   :  { %v1117_v15 = vsel %vm817_vm4, %v1052_v54, 0.0  ;;  %v1115_v14 = vrot.slane %v1114_v11, 1 }
 0x243   :  { %v1094_v17 = vadd.f32 %v1093_v13, %v1092_v61  ;;  %v1119_v12 = vadd.f32 %v1118_v42, %v1117_v15 }
 0x244   :  { %v1116_v53 = vadd.f32 %v1115_v14, %v1114_v11 }
 0x245   :  { %v1095_v35 = vrot.slane %v1094_v17, 2  ;;  %v1120_v56 = vrot.slane %v1119_v12, 4 }
 0x247   :  { %v1096_v46 = vadd.f32 %v1095_v35, %v1094_v17  ;;  %v1121_v33 = vadd.f32 %v1120_v56, %v1119_v12 }
 0x249   :  { %v1097_v21 = vrot.slane %v1096_v46, 1  ;;  %v1122_v24 = vrot.slane %v1121_v33, 2 }
 0x24b   :  { %v1098_v0 = vadd.f32 %v1097_v21, %v1096_v46  ;;  %v1123_v47 = vadd.f32 %v1122_v24, %v1121_v33 }
 0x24d   :  { %v1146_v59 = vsel %vm164_vm10, %v1098_v0, %v1145_v8  ;;  %v1124_v1 = vrot.slane %v1123_v47, 1 }
 0x24e   :  { %v1147_v44 = vsel %vm166_vm11, %v1107_v9, %v1146_v59 }
 0x24f   :  { %v1125_v16 = vadd.f32 %v1124_v1, %v1123_v47  ;;  %v1148_v2 = vsel %vm168_vm12, %v1116_v53, %v1147_v44 }
 0x251   :  { %v1149_v19 = vsel %vm170_vm13, %v1125_v16, %v1148_v2 }
 0x252   :  { %1316 = vmatmul.mubr.msk.f32.vlgmr.msra.gmra.mrb[6].mxu1 %vm817_vm4, %v1149_v19 }
 0x325   :  { %v1218_v20 = vpop.f32.mrb[6].mxu1 }
 0x326   :  { %v1219_v62 = vadd.f32 %v1257_v41, %v1218_v20  ;;  %v1317_v22 = vpop.f32.mrb[7].mxu1 }
 0x328   :  { %v1222_v23 = vmax.f32 %v1219_v62, 0.0 }
 0x32a   :  { %1224 = vst.msk [vmem:[#allocation3] sm:$0xff] %vm1223_vm14, %v1222_v23 }
 0x32b   :  { %1352 = shalt.err (!%p1349_p4)
}
 0x32c   :  { %s1353_s6 = scalar_lea.hbm %s1941_s7, 128 }
 0x32d   :  { %p1354_p5 = scmp.ne.s32.totalorder %s1941_s7, %s1353_s6  ;;  %p1357_p6 = scmp.lt.u32.totalorder %s1353_s6, %s1941_s7 }
 0x32f   :  { %p1359_p7 = pnand %p1357_p6, %p1354_p5 }
 0x331   :  { %1362 = shalt.err (!%p1359_p7)
}
 0x332   :  { %1234 = dma.vmem_to_hbm [thread:$0]  %s1232_s18, 128, %s1941_s7, [#allocation4]  }
 0x333   :  { %1363 = dma.done.wait [#allocation4], 128  }
 0x334   :  { %1364 = vsyncadd [#allocation4], 4294967168 }
 0x335   :  { %1238 = vsyncpa [#allocation4], 1 }

</bundles_post_ra>
